<compile_context>
chip_gen: v7x
topology: tpu7x:2x2x1
jax: 0.10.0
libtpu: 0.0.40
codegen_flags: <defaults>
</compile_context>

<pallas_src>
import functools
import math

import jax
import jax.numpy as jnp
from jax.experimental import pallas as pl
from jax.experimental.pallas import tpu as pltpu


def _silu(x):
    return x * jax.nn.sigmoid(x)


def _gated_equivariant_kernel(
    x_ref,      # (tn, H)       scalar features tile
    v_ref,      # (3, tn, H)    vector features tile, spatial-major
    w12_ref,    # (H, H+O)      fused [vec1_proj | vec2_proj] weight (in x out)
    wu1x_ref,   # (H, I)        update_net[0] weight, x half
    wu1v_ref,   # (H, I)        update_net[0] weight, vec1 half
    b1_ref,     # (1, I)
    wu2_ref,    # (I, 2O)       update_net[2] weight
    b2_ref,     # (1, 2O)
    out_ref,    # (tn, 4O)      packed [x_out | v_out_x | v_out_y | v_out_z]
    *,
    hidden_channels: int,
    out_channels: int,
    scalar_activation: bool,
):
    H, O = hidden_channels, out_channels
    w12 = w12_ref[...]

    # One fused (tn, H) @ (H, H+O) MXU matmul per spatial component.
    sq_sum = None
    vec2 = []
    for c in range(3):                       # static unroll over the 3 spatial axes
        p = jnp.dot(v_ref[c], w12, preferred_element_type=jnp.float32)  # (tn, H+O)
        vp1 = p[:, :H]                       # vec1_proj component (f32)
        vec2.append(p[:, H:])                # vec2_proj component (tn, O) f32
        sq = vp1 * vp1                       # VPU
        sq_sum = sq if sq_sum is None else sq_sum + sq
    vec1 = jnp.sqrt(sq_sum)                  # (tn, H) f32  ||vec1_proj(v)|| over xyz

    # update_net(cat([x, vec1], -1)) without the lane-axis concat: split wu1.
    h = (jnp.dot(x_ref[...], wu1x_ref[...], preferred_element_type=jnp.float32)
         + jnp.dot(vec1, wu1v_ref[...], preferred_element_type=jnp.float32)
         + b1_ref[...])
    h = _silu(h)                             # (tn, I) f32   (sigmoid -> EUP)
    u = jnp.dot(h, wu2_ref[...], preferred_element_type=jnp.float32) + b2_ref[...]

    x_out = u[:, :O]                         # (tn, O)
    gate = u[:, O:]                          # (tn, O)
    if scalar_activation:
        x_out = _silu(x_out)

    packed = jnp.concatenate([x_out] + [gate * v2 for v2 in vec2], axis=-1)
    out_ref[...] = packed.astype(out_ref.dtype)


def _choose_tile(n8, tile_n, H, O, act_bytes):
    """Pick the node tile: big (VMEM-budgeted), multiple of 8, <= padded N."""
    # Double-buffered activation bytes per node row: x + 3*v + packed out.
    row_bytes = (H + 3 * H + 4 * O) * act_bytes
    budget = 24 * 1024 * 1024        # activations only; weights + headroom live outside
    cap = max(8, (budget // (2 * row_bytes)) // 8 * 8)
    tn = min(((tile_n + 7) // 8) * 8, cap, n8)
    # Prefer >= 2 grid steps so the "parallel" axis can shard across v7x's 2 TCs.
    if n8 > 8 and tn >= n8:
        tn = max(8, ((n8 // 2 + 7) // 8) * 8)
    return tn


def gated_equivariant_block(x, v, params, *, out_channels,
                            scalar_activation=False, tile_n=512, dtype=None):
    """x: (N, H), v: (N, 3, H). Returns (x_out (N, O), v_out (N, 3, O)).

    `dtype=jnp.bfloat16` casts activations/weights for DMA+MXU (f32 accumulate
    is preserved inside the kernel); outputs keep x's original dtype.
    """
    N, H = x.shape
    assert v.shape == (N, 3, H)
    w1, w2, wu1, b1, wu2, b2 = params
    I = wu1.shape[1]
    O = out_channels
    out_dtype = x.dtype

    # Rearrange weights for the kernel layout.
    w12 = jnp.concatenate([w1, w2], axis=1)          # (H, H+O) fused projection
    wu1x, wu1v = wu1[:H], wu1[H:]                    # (H, I) each
    b1 = b1.reshape(1, I)
    b2 = b2.reshape(1, 2 * O)

    if dtype is not None:
        x = x.astype(dtype)
        v = v.astype(dtype)
        w12, wu1x, wu1v, b1, wu2, b2 = (
            a.astype(dtype) for a in (w12, wu1x, wu1v, b1, wu2, b2))

    # Spatial-major v: (3, N, H) so each spatial slice is a 2-D matmul operand.
    v_sm = jnp.transpose(v, (1, 0, 2))

    act_b = jnp.dtype(x.dtype).itemsize
    n8 = ((N + 7) // 8) * 8
    tn = _choose_tile(n8, tile_n, H, O, act_b)
    grid_n = pl.cdiv(n8, tn)
    n_pad = grid_n * tn
    if n_pad != N:
        x = jnp.pad(x, ((0, n_pad - N), (0, 0)))
        v_sm = jnp.pad(v_sm, ((0, 0), (0, n_pad - N), (0, 0)))

    # Scoped-VMEM budget: double-buffered I/O tiles + resident weights, with
    # headroom, capped at 64 MiB so it is also valid on v7x.
    w_b = jnp.dtype(w12.dtype).itemsize
    tile_bytes = 2 * (tn * H + 3 * tn * H + tn * 4 * O) * act_b
    weight_bytes = 2 * (H * (H + O) + 2 * H * I + I + I * 2 * O + 2 * O) * w_b
    vmem_limit = int(min(max(2 * (tile_bytes + weight_bytes), 32 * 1024 * 1024),
                         64 * 1024 * 1024))

    kernel = functools.partial(
        _gated_equivariant_kernel,
        hidden_channels=H,
        out_channels=O,
        scalar_activation=scalar_activation,
    )

    out_packed = pl.pallas_call(
        kernel,
        out_shape=jax.ShapeDtypeStruct((n_pad, 4 * O), out_dtype),
        grid_spec=pltpu.PrefetchScalarGridSpec(
            num_scalar_prefetch=0,
            grid=(grid_n,),
            in_specs=[
                pl.BlockSpec((tn, H), lambda i: (i, 0)),          # x tile
                pl.BlockSpec((3, tn, H), lambda i: (0, i, 0)),    # v tile (spatial-major)
                pl.BlockSpec((H, H + O), lambda i: (0, 0)),       # fused w1|w2 (resident)
                pl.BlockSpec((H, I), lambda i: (0, 0)),           # wu1 (x half)
                pl.BlockSpec((H, I), lambda i: (0, 0)),           # wu1 (vec1 half)
                pl.BlockSpec((1, I), lambda i: (0, 0)),           # b1
                pl.BlockSpec((I, 2 * O), lambda i: (0, 0)),       # wu2
                pl.BlockSpec((1, 2 * O), lambda i: (0, 0)),       # b2
            ],
            out_specs=pl.BlockSpec((tn, 4 * O), lambda i: (i, 0)),  # packed, lane-dense
        ),
        compiler_params=pltpu.CompilerParams(
            dimension_semantics=("parallel",),
            vmem_limit_bytes=vmem_limit,
        ),
    )(x, v_sm, w12, wu1x, wu1v, b1, wu2, b2)

    out_packed = out_packed[:N]
    x_out = out_packed[:, :O]
    v_out = out_packed[:, O:].reshape(N, 3, O)
    return x_out, v_out


def _xavier_uniform(key, fan_in, fan_out, dtype=jnp.float32):
    bound = math.sqrt(6.0 / (fan_in + fan_out))
    # Stored as (fan_in, fan_out): already the transpose of torch's (out, in).
    return jax.random.uniform(key, (fan_in, fan_out), dtype, -bound, bound)


def init_params(key, hidden_channels, out_channels, intermediate_channels=None):
    if intermediate_channels is None:
        intermediate_channels = hidden_channels
    H, O, I = hidden_channels, out_channels, intermediate_channels
    k1, k2, k3, k4 = jax.random.split(key, 4)
    w1 = _xavier_uniform(k1, H, H)            # vec1_proj (no bias)
    w2 = _xavier_uniform(k2, H, O)            # vec2_proj (no bias)
    wu1 = _xavier_uniform(k3, 2 * H, I)       # update_net[0]
    b1 = jnp.zeros((1, I), jnp.float32)
    wu2 = _xavier_uniform(k4, I, 2 * O)       # update_net[2]
    b2 = jnp.zeros((1, 2 * O), jnp.float32)
    return (w1, w2, wu1, b1, wu2, b2)


def _reference(x, v, params, out_channels, scalar_activation):
    w1, w2, wu1, b1, wu2, b2 = params
    vec1 = jnp.linalg.norm(jnp.einsum("ncd,de->nce", v, w1), axis=-2)
    vec2 = jnp.einsum("ncd,do->nco", v, w2)
    xin = jnp.concatenate([x, vec1], axis=-1)
    h = _silu(xin @ wu1 + b1)
    u = h @ wu2 + b2
    x_out, gate = u[:, :out_channels], u[:, out_channels:]
    v_out = gate[:, None, :] * vec2
    if scalar_activation:
        x_out = _silu(x_out)
    return x_out, v_out


if __name__ == "__main__":
    hidden_channels = 32
    out_channels = 16
    N = 20                  # non-multiple of 8: exercises padding + 2-step grid
    scalar_activation = True

    key = jax.random.PRNGKey(0)
    kx, kv, kp = jax.random.split(key, 3)
    x = jax.random.normal(kx, (N, hidden_channels), jnp.float32)
    v = jax.random.normal(kv, (N, 3, hidden_channels), jnp.float32)
    params = init_params(kp, hidden_channels, out_channels)

    x_out, v_out = gated_equivariant_block(
        x, v, params,
        out_channels=out_channels,
        scalar_activation=scalar_activation,
        tile_n=512,
    )
    jax.block_until_ready((x_out, v_out))

    x_ref, v_ref = _reference(x, v, params, out_channels, scalar_activation)
    assert x_out.shape == (N, out_channels)
    assert v_out.shape == (N, 3, out_channels)
    assert jnp.allclose(x_out, x_ref, atol=1e-5, rtol=1e-5)
    assert jnp.allclose(v_out, v_ref, atol=1e-5, rtol=1e-5)

    print("KERNEL_OK")
</pallas_src>

<mosaic_0001>
module attributes {stable_mosaic.version = 11 : i64} {
  func.func @_gated_equivariant_kernel(%arg0: i32, %arg1: memref<16x32xf32, #tpu.memory_space<vmem>>, %arg2: memref<3x16x32xf32, #tpu.memory_space<vmem>>, %arg3: memref<32x48xf32, #tpu.memory_space<vmem>>, %arg4: memref<32x32xf32, #tpu.memory_space<vmem>>, %arg5: memref<32x32xf32, #tpu.memory_space<vmem>>, %arg6: memref<1x32xf32, #tpu.memory_space<vmem>>, %arg7: memref<32x32xf32, #tpu.memory_space<vmem>>, %arg8: memref<1x32xf32, #tpu.memory_space<vmem>>, %arg9: memref<16x64xf32, #tpu.memory_space<vmem>>) attributes {dimension_semantics = [#tpu.dimension_semantics<parallel>], iteration_bounds = array<i64: 2>, scalar_prefetch = 0 : i64, scratch_operands = 0 : i64, tpu.core_type = #tpu.core_type<tc>, window_params = [{transform_indices = @transform_0, window_bounds = array<i64: 16, 32>}, {transform_indices = @transform_1, window_bounds = array<i64: 3, 16, 32>}, {pipeline_mode = #tpu.pipeline_mode<synchronous>, transform_indices = @transform_2, window_bounds = array<i64: 32, 48>}, {pipeline_mode = #tpu.pipeline_mode<synchronous>, transform_indices = @transform_3, window_bounds = array<i64: 32, 32>}, {pipeline_mode = #tpu.pipeline_mode<synchronous>, transform_indices = @transform_4, window_bounds = array<i64: 32, 32>}, {pipeline_mode = #tpu.pipeline_mode<synchronous>, transform_indices = @transform_5, window_bounds = array<i64: 1, 32>}, {pipeline_mode = #tpu.pipeline_mode<synchronous>, transform_indices = @transform_6, window_bounds = array<i64: 32, 32>}, {pipeline_mode = #tpu.pipeline_mode<synchronous>, transform_indices = @transform_7, window_bounds = array<i64: 1, 32>}, {transform_indices = @transform_8, window_bounds = array<i64: 16, 64>}]} {
    %c0 = arith.constant 0 : index
    %c0_0 = arith.constant 0 : index
    %0 = vector.load %arg3[%c0, %c0_0] : memref<32x48xf32, #tpu.memory_space<vmem>>, vector<32x48xf32>
    %c0_1 = arith.constant 0 : index
    %c0_2 = arith.constant 0 : index
    %c0_3 = arith.constant 0 : index
    %1 = vector.load %arg2[%c0_1, %c0_2, %c0_3] : memref<3x16x32xf32, #tpu.memory_space<vmem>>, vector<1x16x32xf32>
    %2 = vector.shape_cast %1 : vector<1x16x32xf32> to vector<16x32xf32>
    %cst = arith.constant dense<0.000000e+00> : vector<16x48xf32>
    %3 = tpu.matmul %2, %0, %cst {dimension_numbers = #tpu.dot_dimension_numbers<[1], [0], [0], [1], [0, 0, 1, 1], [], []>} : vector<16x32xf32>, vector<32x48xf32>, vector<16x48xf32> -> vector<16x48xf32>
    %4 = vector.extract_strided_slice %3 {offsets = [0, 0], sizes = [16, 32], strides = [1, 1]} : vector<16x48xf32> to vector<16x32xf32>
    %5 = vector.extract_strided_slice %3 {offsets = [0, 32], sizes = [16, 16], strides = [1, 1]} : vector<16x48xf32> to vector<16x16xf32>
    %6 = arith.mulf %4, %4 : vector<16x32xf32>
    %c1 = arith.constant 1 : index
    %c0_4 = arith.constant 0 : index
    %c0_5 = arith.constant 0 : index
    %7 = vector.load %arg2[%c1, %c0_4, %c0_5] : memref<3x16x32xf32, #tpu.memory_space<vmem>>, vector<1x16x32xf32>
    %8 = vector.shape_cast %7 : vector<1x16x32xf32> to vector<16x32xf32>
    %cst_6 = arith.constant dense<0.000000e+00> : vector<16x48xf32>
    %9 = tpu.matmul %8, %0, %cst_6 {dimension_numbers = #tpu.dot_dimension_numbers<[1], [0], [0], [1], [0, 0, 1, 1], [], []>} : vector<16x32xf32>, vector<32x48xf32>, vector<16x48xf32> -> vector<16x48xf32>
    %10 = vector.extract_strided_slice %9 {offsets = [0, 0], sizes = [16, 32], strides = [1, 1]} : vector<16x48xf32> to vector<16x32xf32>
    %11 = vector.extract_strided_slice %9 {offsets = [0, 32], sizes = [16, 16], strides = [1, 1]} : vector<16x48xf32> to vector<16x16xf32>
    %12 = arith.mulf %10, %10 : vector<16x32xf32>
    %13 = arith.addf %6, %12 : vector<16x32xf32>
    %c2 = arith.constant 2 : index
    %c0_7 = arith.constant 0 : index
    %c0_8 = arith.constant 0 : index
    %14 = vector.load %arg2[%c2, %c0_7, %c0_8] : memref<3x16x32xf32, #tpu.memory_space<vmem>>, vector<1x16x32xf32>
    %15 = vector.shape_cast %14 : vector<1x16x32xf32> to vector<16x32xf32>
    %cst_9 = arith.constant dense<0.000000e+00> : vector<16x48xf32>
    %16 = tpu.matmul %15, %0, %cst_9 {dimension_numbers = #tpu.dot_dimension_numbers<[1], [0], [0], [1], [0, 0, 1, 1], [], []>} : vector<16x32xf32>, vector<32x48xf32>, vector<16x48xf32> -> vector<16x48xf32>
    %17 = vector.extract_strided_slice %16 {offsets = [0, 0], sizes = [16, 32], strides = [1, 1]} : vector<16x48xf32> to vector<16x32xf32>
    %18 = vector.extract_strided_slice %16 {offsets = [0, 32], sizes = [16, 16], strides = [1, 1]} : vector<16x48xf32> to vector<16x16xf32>
    %19 = arith.mulf %17, %17 : vector<16x32xf32>
    %20 = arith.addf %13, %19 : vector<16x32xf32>
    %21 = math.sqrt %20 : vector<16x32xf32>
    %c0_10 = arith.constant 0 : index
    %c0_11 = arith.constant 0 : index
    %22 = vector.load %arg1[%c0_10, %c0_11] : memref<16x32xf32, #tpu.memory_space<vmem>>, vector<16x32xf32>
    %c0_12 = arith.constant 0 : index
    %c0_13 = arith.constant 0 : index
    %23 = vector.load %arg4[%c0_12, %c0_13] : memref<32x32xf32, #tpu.memory_space<vmem>>, vector<32x32xf32>
    %cst_14 = arith.constant dense<0.000000e+00> : vector<16x32xf32>
    %24 = tpu.matmul %22, %23, %cst_14 {dimension_numbers = #tpu.dot_dimension_numbers<[1], [0], [0], [1], [0, 0, 1, 1], [], []>} : vector<16x32xf32>, vector<32x32xf32>, vector<16x32xf32> -> vector<16x32xf32>
    %c0_15 = arith.constant 0 : index
    %c0_16 = arith.constant 0 : index
    %25 = vector.load %arg5[%c0_15, %c0_16] : memref<32x32xf32, #tpu.memory_space<vmem>>, vector<32x32xf32>
    %cst_17 = arith.constant dense<0.000000e+00> : vector<16x32xf32>
    %26 = tpu.matmul %21, %25, %cst_17 {dimension_numbers = #tpu.dot_dimension_numbers<[1], [0], [0], [1], [0, 0, 1, 1], [], []>} : vector<16x32xf32>, vector<32x32xf32>, vector<16x32xf32> -> vector<16x32xf32>
    %27 = arith.addf %24, %26 : vector<16x32xf32>
    %c0_18 = arith.constant 0 : index
    %c0_19 = arith.constant 0 : index
    %28 = vector.load %arg6[%c0_18, %c0_19] : memref<1x32xf32, #tpu.memory_space<vmem>>, vector<1x32xf32>
    %29 = vector.broadcast %28 : vector<1x32xf32> to vector<16x32xf32>
    %30 = arith.addf %27, %29 : vector<16x32xf32>
    %31 = arith.negf %30 : vector<16x32xf32>
    %32 = math.exp %31 : vector<16x32xf32>
    %cst_20 = arith.constant 1.000000e+00 : f32
    %33 = vector.broadcast %cst_20 : f32 to vector<16x32xf32>
    %34 = arith.addf %33, %32 : vector<16x32xf32>
    %35 = arith.divf %33, %34 : vector<16x32xf32>
    %36 = arith.mulf %30, %35 : vector<16x32xf32>
    %c0_21 = arith.constant 0 : index
    %c0_22 = arith.constant 0 : index
    %37 = vector.load %arg7[%c0_21, %c0_22] : memref<32x32xf32, #tpu.memory_space<vmem>>, vector<32x32xf32>
    %cst_23 = arith.constant dense<0.000000e+00> : vector<16x32xf32>
    %38 = tpu.matmul %36, %37, %cst_23 {dimension_numbers = #tpu.dot_dimension_numbers<[1], [0], [0], [1], [0, 0, 1, 1], [], []>} : vector<16x32xf32>, vector<32x32xf32>, vector<16x32xf32> -> vector<16x32xf32>
    %c0_24 = arith.constant 0 : index
    %c0_25 = arith.constant 0 : index
    %39 = vector.load %arg8[%c0_24, %c0_25] : memref<1x32xf32, #tpu.memory_space<vmem>>, vector<1x32xf32>
    %40 = vector.broadcast %39 : vector<1x32xf32> to vector<16x32xf32>
    %41 = arith.addf %38, %40 : vector<16x32xf32>
    %42 = vector.extract_strided_slice %41 {offsets = [0, 0], sizes = [16, 16], strides = [1, 1]} : vector<16x32xf32> to vector<16x16xf32>
    %43 = vector.extract_strided_slice %41 {offsets = [0, 16], sizes = [16, 16], strides = [1, 1]} : vector<16x32xf32> to vector<16x16xf32>
    %44 = arith.negf %42 : vector<16x16xf32>
    %45 = math.exp %44 : vector<16x16xf32>
    %cst_26 = arith.constant 1.000000e+00 : f32
    %46 = vector.broadcast %cst_26 : f32 to vector<16x16xf32>
    %47 = arith.addf %46, %45 : vector<16x16xf32>
    %48 = arith.divf %46, %47 : vector<16x16xf32>
    %49 = arith.mulf %42, %48 : vector<16x16xf32>
    %50 = arith.mulf %43, %5 : vector<16x16xf32>
    %51 = arith.mulf %43, %11 : vector<16x16xf32>
    %52 = arith.mulf %43, %18 : vector<16x16xf32>
    %53 = tpu.concatenate %49, %50, %51, %52 in 1 : vector<16x16xf32>, vector<16x16xf32>, vector<16x16xf32>, vector<16x16xf32> -> vector<16x64xf32>
    %c0_27 = arith.constant 0 : index
    %c0_28 = arith.constant 0 : index
    %54 = vector.load %arg9[%c0_27, %c0_28] : memref<16x64xf32, #tpu.memory_space<vmem>>, vector<16x64xf32>
    tpu.vector_store %arg9[%c0_27, %c0_28], %53 {strides = array<i32>} : memref<16x64xf32, #tpu.memory_space<vmem>>, vector<16x64xf32>,
    return
  }
  func.func @transform_0(%arg0: i32) -> (i32, i32) {
    %c0_i32 = arith.constant 0 : i32
    %c0_i32_0 = arith.constant 0 : i32
    return %arg0, %c0_i32 : i32, i32
  }
  func.func @transform_1(%arg0: i32) -> (i32, i32, i32) {
    %c0_i32 = arith.constant 0 : i32
    %c0_i32_0 = arith.constant 0 : i32
    %c0_i32_1 = arith.constant 0 : i32
    return %c0_i32, %arg0, %c0_i32_0 : i32, i32, i32
  }
  func.func @transform_2(%arg0: i32) -> (i32, i32) {
    %c0_i32 = arith.constant 0 : i32
    %c0_i32_0 = arith.constant 0 : i32
    %c0_i32_1 = arith.constant 0 : i32
    return %c0_i32, %c0_i32_0 : i32, i32
  }
  func.func @transform_3(%arg0: i32) -> (i32, i32) {
    %c0_i32 = arith.constant 0 : i32
    %c0_i32_0 = arith.constant 0 : i32
    %c0_i32_1 = arith.constant 0 : i32
    return %c0_i32, %c0_i32_0 : i32, i32
  }
  func.func @transform_4(%arg0: i32) -> (i32, i32) {
    %c0_i32 = arith.constant 0 : i32
    %c0_i32_0 = arith.constant 0 : i32
    %c0_i32_1 = arith.constant 0 : i32
    return %c0_i32, %c0_i32_0 : i32, i32
  }
  func.func @transform_5(%arg0: i32) -> (i32, i32) {
    %c0_i32 = arith.constant 0 : i32
    %c0_i32_0 = arith.constant 0 : i32
    %c0_i32_1 = arith.constant 0 : i32
    return %c0_i32, %c0_i32_0 : i32, i32
  }
  func.func @transform_6(%arg0: i32) -> (i32, i32) {
    %c0_i32 = arith.constant 0 : i32
    %c0_i32_0 = arith.constant 0 : i32
    %c0_i32_1 = arith.constant 0 : i32
    return %c0_i32, %c0_i32_0 : i32, i32
  }
  func.func @transform_7(%arg0: i32) -> (i32, i32) {
    %c0_i32 = arith.constant 0 : i32
    %c0_i32_0 = arith.constant 0 : i32
    %c0_i32_1 = arith.constant 0 : i32
    return %c0_i32, %c0_i32_0 : i32, i32
  }
  func.func @transform_8(%arg0: i32) -> (i32, i32) {
    %c0_i32 = arith.constant 0 : i32
    %c0_i32_0 = arith.constant 0 : i32
    return %arg0, %c0_i32 : i32, i32
  }
}

</mosaic_0001>

<bundles_post_ra>
// kernel: tpu_custom_call.1
= control target key start
LH: loop header
LB: loop body
LE: loop exit
PB: predicated region body
PF: predicated region fallthrough
CT: control target
= control target key end

     0   :  { %s2205_s0 = inlined_call_operand.hbm [shape: f32[32,32], index: 0, kind: input, shape index: {}]   ;;  %s2206_s1 = inlined_call_operand.hbm [shape: f32[3,32,32], index: 1, kind: input, shape index: {}]   ;;  %s2207_s2 = inlined_call_operand.hbm [shape: f32[32,48], index: 2, kind: input, shape index: {}]   ;;  %s2208_s3 = inlined_call_operand.hbm [shape: f32[32,32], index: 3, kind: input, shape index: {}]   ;;  %s2209_s4 = inlined_call_operand.hbm [shape: f32[32,32], index: 4, kind: input, shape index: {}]   ;;  %s2210_s5 = inlined_call_operand.vmem [shape: f32[1,32], index: 5, kind: input, shape index: {}]   ;;  %s2211_s6 = inlined_call_operand.hbm [shape: f32[32,32], index: 6, kind: input, shape index: {}]   ;;  %s2212_s7 = inlined_call_operand.vmem [shape: f32[1,32], index: 7, kind: input, shape index: {}]   ;;  %s2213_s8 = inlined_call_operand.hbm [shape: f32[32,64], index: 8, kind: output, shape index: {}]  }
   0x1   :  { %2226 = sst [smem:[#allocation28_spill]] %s2208_s3 }
   0x2   :  { %2227 = sst [smem:[#allocation29_spill]] %s2213_s8 }
   0x3   :  { %13 = vsyncpa [#allocation3], 0 }
   0x4   :  { %15 = vsyncpa [#allocation3 + $0x1], 0 }
   0x5   :  { %16 = vsyncpa [#allocation6], 0 }
   0x6   :  { %18 = vsyncpa [#allocation6 + $0x1], 0 }
   0x7   :  { %19 = vsyncpa [#allocation9], 0 }
   0x8   :  { %20 = vsyncpa [#allocation12], 0 }
   0x9   :  { %21 = vsyncpa [#allocation4], 0 }
   0xa   :  { %23 = vsyncpa [#allocation4 + $0x1], 0  ;;  %s1857_s27 = smov 0   ;;  %s1859_s28 = smov 0  }
   0xb   :  { %s1861_s29 = smov 0   ;;  %s1863_s30 = smov 0  }
   0xc LB: > { %2228 = sst [smem:[#allocation23_spill]] %s1777_s27  ;;  %s1878_s9 = sadd.s32 4294967295, %s1789_s30   ;;  %s1789_s30 = sphi %s1863_s30, %s2256_s30   ;;  %s1785_s29 = sphi %s1861_s29, %s2260_s29   ;;  %s1781_s28 = sphi %s1859_s28, %s2259_s28   ;;  %s1777_s27 = sphi %s1857_s27, %s2258_s27  }
   0xd   : > { %s1236_s10 = sadd.s32 4294967294, %s1789_s30   ;;  %s1882_s11 = sadd.s32 1, %s1789_s30  }
   0xe   : > { %2229 = sst [smem:[#allocation24_spill]] %s1882_s11  ;;  %s36_s12 = sadd.s32 1, %s1785_s29 }
   0xf   : > { %s33_s13 = ssub.s32 %s1789_s30, %s1882_s11  ;;  %p43_p0 = scmp.ne.s32.totalorder %s1785_s29, %s1781_s28 }
  0x10   : > { %p34_p1 = scmp.eq.s32.totalorder %s33_s13, 0  ;;  %p44_p2 = scmp.eq.s32.totalorder %s1789_s30, 0 }
  0x11   : > { %p49_p3 = scmp.ne.s32.totalorder %s1781_s28, %s1777_s27  ;;  %p2214_p4 = scmp.eq.s32.totalorder %s1878_s9, 0 }
  0x12   : > { %s1894_s14 = scalar_select %p34_p1, %s1785_s29, %s36_s12  }
  0x13   : > { %p1896_p5 = por %p44_p2, %p43_p0  ;;  %p1902_p6 = por %p2214_p4, %p49_p3 }
  0x14   : > { %2230 = sst [smem:[#allocation25_spill]] %s1894_s14  ;;  %p225_p7 = scmp.eq.s32.totalorder %s1878_s9, 1 }
  0x15   : > { %s2231_s15 = scalar_select %p1896_p5, 1, 0 }
  0x16   : > { %s2232_s16 = scalar_select %p1902_p6, 1, 0 }
  0x17   : > { %p231_p8 = scmp.eq.s32.totalorder %s1236_s10, 1  ;;  %p1237_p9 = scmp.ge.s32.totalorder %s1789_s30, 1 }
  0x18   : > { %p238_p10 = scmp.lt.s32.totalorder %s1789_s30, 3  ;;  %p1909_p11 = por %p225_p7, %p43_p0 }
  0x19   : > { %p1913_p12 = por %p231_p8, %p49_p3  ;;  %s1791_s20 = smov [#allocation8]  }
  0x1a   : > { %s2233_s17 = scalar_select %p1909_p11, 1, 0 }
  0x1b   : > { %s2235_s18 = scalar_select %p1913_p12, 1, 0 }
  0x1c   : > { %2234 = sst [smem:[#allocation26_spill]] %s2233_s17  ;;  %p1917_p13 = pnand %p1237_p9, %p238_p10 }
  0x1d   : > { %2236 = sst [smem:[#allocation27_spill]] %s2235_s18  ;;  %s263_s21 = sshll.u32 %s1791_s20, 4  ;;  %s264_s21 = int_to_ptr.vmem [resolvable:$true] %s263_s21 }
  0x1e   : > { %s2237_s19 = scalar_select %p1917_p13, 1, 0 }
  0x1f   : > { %p1470_p1 = pneg %p1917_p13  ;;  %s1792_s23 = smov [#allocation7]  }
  0x20   : > { %s250_s24 = sshll.u32 %s1792_s23, 4  ;;  %s2239_s3 = sld [smem:[#allocation28_spill]]  ;;  %s1929_s24 = int_to_ptr.vmem [resolvable:$true] %s250_s24 }
  0x21   : > { %p1925_p2 = pnand %p1470_p1, %p2214_p4 }
  0x23   : > { %p1939_p3 = pneg %p1925_p2 }
  0x26   : > { %s1567_s10 = scalar_lea.hbm %s2239_s3, 512 }
  0x27   : > { %p1568_p0 = scmp.ne.s32.totalorder %s2239_s3, %s1567_s10  ;;  %p1574_p9 = scmp.lt.u32.totalorder %s1567_s10, %s2239_s3 }
  0x29   : > { %p1570_p7 = pnand %p1939_p3, %p1568_p0 }
  0x2b   : > { %p1571_p8 = pneg %p1570_p7 }
  0x2d   : > { %p1576_p10 = pnand %p1574_p9, %p1571_p8 }
  0x2f   : > { %1579 = shalt.err (!%p1576_p10)
}
  0x30   : > { %s1580_s25 = scalar_lea.vmem %s264_s21, 512  ;;  %p1588_p11 = scmp.lt.s32.totalorder %s264_s21, %s264_s21 }
  0x31   : > { %p1581_p1 = scmp.ne.s32.totalorder %s264_s21, %s1580_s25  ;;  %p1589_p6 = scmp.lt.s32.totalorder %s1580_s25, %s1580_s25 }
  0x33   : > { %p1583_p4 = pnand %p1581_p1, %p1939_p3  ;;  %p1590_p13 = por %p1589_p6, %p1588_p11 }
  0x35   : > { %p1584_p12 = pneg %p1583_p4 }
  0x37   : > { %p1591_p5 = pnand %p1590_p13, %p1584_p12 }
  0x39   : > { %1594 = shalt.err (!%p1591_p5)
}
  0x3a   : > { %s1793_s26 = smov 128   ;;  %s1794_s12 = smov 8  }
  0x3b   : > { %1476 = dma.hbm_to_vmem [thread:$0]  (!%p1925_p2), %s2239_s3, 512, %s264_s21, [#allocation9], %s1793_s26, %s1793_s26, %s1794_s12  }
  0x3c   : > { %s1595_s11 = scalar_lea.hbm %s2207_s2, 512 }
  0x3d   : > { %p1596_p4 = scmp.ne.s32.totalorder %s2207_s2, %s1595_s11  ;;  %p1602_p11 = scmp.lt.u32.totalorder %s1595_s11, %s2207_s2 }
  0x3f   : > { %p1598_p5 = pnand %p1596_p4, %p1939_p3 }
  0x41   : > { %p1599_p6 = pneg %p1598_p5 }
  0x43   : > { %p1604_p12 = pnand %p1602_p11, %p1599_p6 }
  0x45   : > { %1607 = shalt.err (!%p1604_p12)
}
  0x46   : > { %s1608_s21 = scalar_lea.vmem %s1929_s24, 512  ;;  %p1616_p8 = scmp.lt.s32.totalorder %s1929_s24, %s1929_s24 }
  0x47   : > { %p1609_p13 = scmp.ne.s32.totalorder %s1929_s24, %s1608_s21  ;;  %p1617_p9 = scmp.lt.s32.totalorder %s1608_s21, %s1608_s21 }
  0x49   : > { %p1611_p0 = pnand %p1609_p13, %p1939_p3  ;;  %p1618_p10 = por %p1617_p9, %p1616_p8 }
  0x4b   : > { %p1612_p7 = pneg %p1611_p0 }
  0x4d   : > { %p1619_p1 = pnand %p1618_p10, %p1612_p7 }
  0x4f   : > { %1622 = shalt.err (!%p1619_p1)
}
  0x50   : > { %1473 = dma.hbm_to_vmem [thread:$0]  (!%p1925_p2), %s2207_s2, 512, %s1929_s24, [#allocation6], %s1793_s26, %s1793_s26, %s1794_s12  }
  0x51   : > { %s1795_s11 = smov [#allocation10]   ;;  %s1796_s14 = smov [#allocation11]  }
  0x52   : > { %s276_s18 = sshll.u32 %s1795_s11, 4  ;;  %s292_s10 = sshll.u32 %s1796_s14, 4  ;;  %s277_s18 = int_to_ptr.vmem [resolvable:$true] %s276_s18  ;;  %s293_s10 = int_to_ptr.vmem [resolvable:$true] %s292_s10 }
  0x53   : > { %s1623_s25 = scalar_lea.hbm %s2209_s4, 512 }
  0x54   : > { %p1624_p4 = scmp.ne.s32.totalorder %s2209_s4, %s1623_s25  ;;  %p1630_p11 = scmp.lt.u32.totalorder %s1623_s25, %s2209_s4 }
  0x56   : > { %p1626_p5 = pnand %p1624_p4, %p1939_p3 }
  0x58   : > { %p1627_p6 = pneg %p1626_p5 }
  0x5a   : > { %p1632_p12 = pnand %p1630_p11, %p1627_p6 }
  0x5c   : > { %1635 = shalt.err (!%p1632_p12)
}
  0x5d   : > { %s1636_s24 = scalar_lea.vmem %s277_s18, 512  ;;  %p1644_p8 = scmp.lt.s32.totalorder %s277_s18, %s277_s18 }
  0x5e   : > { %p1637_p13 = scmp.ne.s32.totalorder %s277_s18, %s1636_s24  ;;  %p1645_p9 = scmp.lt.s32.totalorder %s1636_s24, %s1636_s24 }
  0x60   : > { %p1639_p0 = pnand %p1637_p13, %p1939_p3  ;;  %p1646_p10 = por %p1645_p9, %p1644_p8 }
  0x62   : > { %p1640_p7 = pneg %p1639_p0 }
  0x64   : > { %p1647_p1 = pnand %p1646_p10, %p1640_p7 }
  0x66   : > { %1650 = shalt.err (!%p1647_p1)
}
  0x67   : > { %1479 = dma.hbm_to_vmem [thread:$0]  (!%p1925_p2), %s2209_s4, 512, %s277_s18, [#allocation9], %s1793_s26, %s1793_s26, %s1794_s12  }
  0x68   : > { %s1651_s14 = scalar_lea.hbm %s2211_s6, 512 }
  0x69   : > { %p1652_p4 = scmp.ne.s32.totalorder %s2211_s6, %s1651_s14  ;;  %p1658_p11 = scmp.lt.u32.totalorder %s1651_s14, %s2211_s6 }
  0x6b   : > { %p1654_p5 = pnand %p1652_p4, %p1939_p3 }
  0x6d   : > { %p1655_p6 = pneg %p1654_p5 }
  0x6f   : > { %p1660_p12 = pnand %p1658_p11, %p1655_p6 }
  0x71   : > { %1663 = shalt.err (!%p1660_p12)
}
  0x72   : > { %s1664_s8 = scalar_lea.vmem %s293_s10, 512  ;;  %p1672_p8 = scmp.lt.s32.totalorder %s293_s10, %s293_s10 }
  0x73   : > { %p1665_p13 = scmp.ne.s32.totalorder %s293_s10, %s1664_s8  ;;  %p1673_p9 = scmp.lt.s32.totalorder %s1664_s8, %s1664_s8 }
  0x75   : > { %p1667_p0 = pnand %p1665_p13, %p1939_p3  ;;  %p1674_p10 = por %p1673_p9, %p1672_p8 }
  0x77   : > { %p1668_p7 = pneg %p1667_p0 }
  0x79   : > { %p1675_p1 = pnand %p1674_p10, %p1668_p7 }
  0x7b   : > { %1678 = shalt.err (!%p1675_p1)
}
  0x7c   : > { %1482 = dma.hbm_to_vmem [thread:$0]  (!%p1925_p2), %s2211_s6, 512, %s293_s10, [#allocation12], %s1793_s26, %s1793_s26, %s1794_s12  }
  0x7d   : > { %p1242_p4 = scmp.ge.s32.totalorder %s1789_s30, 2 }
  0x7e   : > { %s2030_s20 = sand.u32 (!%p1242_p4), 1, %s1785_s29   ;;  %s1284_s22 = sshll.u32 (!%p1242_p4), %s1789_s30, 8 }
  0x7f   : > { %305 = sbr.rel (%p1242_p4) target bundleno = 166 (0xa6), region = 40  ;;  %s1243_s3 = sshll.u32 (!%p1242_p4), %s2030_s20, 4 }
  0x80   : > { %s2039_s26 = scalar_lea.hbm (!%p1242_p4), %s2205_s0, %s1284_s22  ;;  %s313_s12 = scalar_lea.vmem (!%p1242_p4), [#allocation2], %s1243_s3 }
  0x81   : > { %s320_s10 = sshll.u32 (!%p1242_p4), %s313_s12, 4  ;;  %s310_s11 = scalar_lea.sflag (!%p1242_p4), [#allocation3], %s2030_s20  ;;  %s2041_s10 = int_to_ptr.vmem [resolvable:$true] %s320_s10 }
  0x82   : > { %s1679_s14 = scalar_lea.hbm (!%p1242_p4), %s2039_s26, 256  ;;  %p2241_p3 = scmp.ne.s32.totalorder (!%p1242_p4), %s2231_s15, 0 }
  0x83   : > { %p1680_p2 = scmp.ne.s32.totalorder (!%p1242_p4), %s2039_s26, %s1679_s14  ;;  %s1683_s25 = scalar_lea.hbm (!%p1242_p4), %s2205_s0, 512 }
  0x84   : > { %p1684_p11 = scmp.lt.u32.totalorder (!%p1242_p4), %s2039_s26, %s2205_s0  ;;  %p1685_p12 = scmp.lt.u32.totalorder (!%p1242_p4), %s1683_s25, %s1679_s14 }
  0x85   : > { %p1681_p5 = pnand (!%p1242_p4), %p1680_p2, %p2241_p3  ;;  %p1687_p0 = scmp.lt.u32.totalorder (!%p1242_p4), %s1679_s14, %s2039_s26 }
  0x86   : > { %p1686_p13 = por %p1685_p12, %p1684_p11 }
  0x87   : > { %p1682_p6 = pneg %p1681_p5 }
  0x88   : > { %p1688_p7 = por %p1687_p0, %p1686_p13 }
  0x8a   : > { %p1689_p8 = pnand %p1688_p7, %p1682_p6 }
  0x8c   : > { %1692 = shalt.err (!%p1689_p8)
}
  0x8d   : > { %s1693_s18 = scalar_lea.vmem %s2041_s10, 256  ;;  %s1797_s24 = smov [#allocation2]  }
  0x8e   : > { %p1694_p9 = scmp.ne.s32.totalorder %s2041_s10, %s1693_s18  ;;  %s1697_s3 = sshll.u32 %s1797_s24, 4  ;;  %s1698_s3 = int_to_ptr.vmem [resolvable:$false] %s1697_s3 }
  0x8f   : > { %s1699_s17 = scalar_lea.vmem %s1698_s3, 512  ;;  %p1700_p2 = scmp.lt.s32.totalorder %s2041_s10, %s1698_s3 }
  0x90   : > { %p1695_p10 = pnand %p1694_p9, %p2241_p3  ;;  %p1701_p5 = scmp.lt.s32.totalorder %s1699_s17, %s1693_s18 }
  0x92   : > { %p1696_p1 = pneg %p1695_p10  ;;  %p1702_p11 = por %p1701_p5, %p1700_p2 }
  0x94   : > { %p1703_p12 = pnand %p1702_p11, %p1696_p1 }
  0x96   : > { %1706 = shalt.err (!%p1703_p12)
}
  0x97   : > { %s1798_s27 = smov 128   ;;  %s1799_s12 = smov 8  }
  0x98   : > { %1449 = dma.hbm_to_vmem [thread:$0]  (%p2241_p3), %s2039_s26, 256, %s2041_s10, %s310_s11, %s1798_s27, %s1798_s27, %s1799_s12  }
  0x99   : > { %s330_s14 = sand.u32 1, %s1789_s30   ;;  %s1439_s13 = smul.u32 48, %s2030_s20 }
  0x9a   : > { %s1450_s23 = scalar_select %p2241_p3, [#allocation0], [#allocation16] }
  0x9b   : > { %s340_s8 = scalar_lea.hbm %s2206_s1, %s1284_s22  ;;  %s1800_s26 = smov 512  }
  0x9c   : > { %1451 = sst [smem:[#allocation15]] (%p2241_p3), %s1800_s26  ;;  %s334_s11 = scalar_lea.vmem [#allocation5], %s1439_s13 }
  0x9d   : > { %s345_s10 = sld [smem:[%s1450_s23]]   ;;  %s353_s18 = sshll.u32 %s334_s11, 4  ;;  %s354_s18 = int_to_ptr.vmem [resolvable:$true] %s353_s18 }
  0x9e   : > { %s1801_s24 = smov 256   ;;  %s1802_s3 = smov 2  }
  0x9f   : > { %1452 = sst [smem:[#allocation15 + $0x1]] (%p2241_p3), %s1801_s24  ;;  %s1803_s20 = smov 128  }
  0xa0   : > { %1453 = sst [smem:[#allocation15 + $0x2]] (%p2241_p3), %s1802_s3  ;;  %s1804_s17 = smov 8  }
  0xa1   : > { %1454 = sst [smem:[#allocation15 + $0x3]] (%p2241_p3), %s1803_s20  ;;  %s331_s12 = scalar_lea.sflag [#allocation6], %s330_s14 }
  0xa2   : > { %1455 = sst [smem:[#allocation15 + $0x4]] (%p2241_p3), %s1803_s20  ;;  %s1805_s13 = smov [#allocation14]  }
  0xa3   : > { %s1248_s22 = sshll.u32 %s345_s10, 26  ;;  %1456 = sst [smem:[#allocation15 + $0x5]] (%p2241_p3), %s1804_s17 }
  0xa4   : > { %s1249_s27 = sadd.s32 134217728, %s1248_s22 }
  0xa5   : > { %1457 = dma.general (%p2241_p3), %s340_s8, 768, %s354_s18, %s331_s12, %s1805_s13, [#allocation15], %s1249_s27, 0  }
  0xa6 PF: > { %p2242_p6 = scmp.ne.s32.totalorder %s2237_s19, 0 }
  0xa7   : > { %s2093_s23 = sand.u32 (!%p2242_p6), 1, %s1781_s28   ;;  %p2243_p13 = scmp.ne.s32.totalorder (!%p2242_p6), %s2232_s16, 0 }
  0xa8   : > { %378 = sbr.rel (%p2242_p6) target bundleno = 1047 (0x417), region = 52  ;;  %s1251_s25 = sshll.u32 (!%p2242_p6), %s2093_s23, 4 }
  0xa9   : > { %s381_s21 = scalar_lea.sflag (!%p2242_p6), [#allocation3], %s2093_s23  ;;  %s2099_s26 = scalar_lea.vmem (!%p2242_p6), [#allocation2], %s1251_s25 }
  0xaf   : > { %1752 = dma.done.wait (%p2243_p13), %s381_s21, 256  }
  0xb0   : > { %1754 = vsyncadd (%p2243_p13), %s381_s21, 4294967040  ;;  %s389_s15 = sand.u32 1, %s1878_s9   ;;  %s1440_s19 = smul.u32 48, %s2093_s23 }
  0xb1   : > { %s390_s14 = scalar_lea.sflag [#allocation6], %s389_s15 }
  0xb2   : > { %s2107_s8 = scalar_lea.vmem [#allocation5], %s1440_s19 }
  0xb3   : > { %1756 = dma.done.wait (%p2243_p13), %s390_s14, 768  }
  0xb4   : > { %1758 = vsyncadd (%p2243_p13), %s390_s14, 4294966528  ;;  %p2244_p3 = scmp.eq.s32.totalorder %s1878_s9, 0 }
  0xb6   : > { %1760 = dma.done.wait (%p2244_p3), [#allocation6], 512   ;;  %p2245_p0 = pmov %p2244_p3 }
  0xb8   : > { %1762 = vsyncadd (%p2245_p0), [#allocation6], 4294966784  ;;  %p2246_p7 = pmov %p2245_p0 }
  0xb9   : > { %p2247_p8 = pmov %p2245_p0 }
  0xba   : > { %1764 = dma.done.wait (%p2246_p7), [#allocation9], 1024  }
  0xbb   : > { %1766 = vsyncadd (%p2247_p8), [#allocation9], 4294966272  ;;  %p2248_p9 = pmov %p2245_p0 }
  0xbc   : > { %p2249_p10 = pmov %p2245_p0 }
  0xbd   : > { %1768 = dma.done.wait (%p2248_p9), [#allocation12], 512  }
  0xbe   : > { %1770 = vsyncadd (%p2249_p10), [#allocation12], 4294966784  ;;  %vm456_vm0 = vcmask 261120   ;;  %v450_v0 = vld [vmem:[#allocation7] sm:$0xff]  ;;  %v451_v1 = vld [vmem:[#allocation7 + $0x8] sm:$0xff]  ;;  %s1806_s16 = smov 112  }
  0xbf   : > { %v452_v2 = vld [vmem:[#allocation7 + $0x10] sm:$0xff]  ;;  %v1389_v3 = vpack.c.bf16 %v451_v1, %v450_v0  ;;  %v453_v4 = vld [vmem:[#allocation7 + $0x18] sm:$0xff]  ;;  %v736_v12 = vld [vmem:[#allocation10] sm:$0xff]  ;;  %s1807_s3 = smov 16   ;;  %s1808_s20 = smov 32   ;;  %vm1077_vm5 = vcmask 130048  }
  0xc0   : > { %v454_v5 = vld [vmem:[%s2107_s8] sm:$0xff]  ;;  %v1259_v6 = vld [vmem:[%s2107_s8 + $0x10] sm:$0xff]  ;;  %v1393_v7 = vpack.c.bf16 %v453_v4, %v452_v2  ;;  %v455_v8 = vld [vmem:[%s2107_s8 + $0x8] sm:$0xff]  ;;  %s446_s22 = scalar_lea.vmem [#allocation13], %s1251_s25  ;;  %s1286_s27 = sshll.u32 %s1878_s9, 8  ;;  %vm1082_vm6 = vcmask 392192  }
  0xc1   : > { %1331 = vmatprep.mubr.msk.f32.mxu0 %vm456_vm0, %v454_v5  ;;  %1342 = vmatprep.mubr.msk.f32.mxu1 %vm456_vm0, %v1259_v6  ;;  %v1260_v9 = vld [vmem:[%s2107_s8 + $0x18] sm:$0xff]  ;;  %v1263_v10 = vld [vmem:[%s2107_s8 + $0x20] sm:$0xff]  ;;  %v1264_v11 = vld [vmem:[%s2107_s8 + $0x28] sm:$0xff]  ;;  %s1102_s17 = sshll.u32 %s446_s22, 4  ;;  %s2250_s12 = sld [smem:[#allocation26_spill]]  ;;  %vm1085_vm7 = vcmask 523264   ;;  %s2154_s17 = int_to_ptr.vmem [resolvable:$true] %s1102_s17 }
  0xc2   : > { %1390 = vmatprep.subr.bf16.mxu0 %v1389_v3  ;;  %1398 = vmatprep.subr.bf16.mxu1 %v1389_v3  ;;  %v737_v13 = vld [vmem:[#allocation10 + $0x8] sm:$0xff]  ;;  %v738_v14 = vld [vmem:[#allocation10 + $0x10] sm:$0xff]  ;;  %v739_v16 = vld [vmem:[#allocation10 + $0x18] sm:$0xff]  ;;  %s2251_s21 = sld [smem:[#allocation29_spill]]  ;;  %s1089_s9 = scalar_lea.sflag [#allocation4], %s2093_s23 }
  0xc3   : > { %1392 = vmatpush3.bf16.msra.mxu0 %v1389_v3  ;;  %1400 = vmatpush3.bf16.msra.mxu1 %v1389_v3  ;;  %v1413_v15 = vpack.c.bf16 %v737_v13, %v736_v12  ;;  %v1417_v17 = vpack.c.bf16 %v739_v16, %v738_v14  ;;  %v732_v18 = vld [vmem:[#allocation8] sm:$0xff]  ;;  %v733_v19 = vld [vmem:[#allocation8 + $0x8] sm:$0xff]  ;;  %v734_v41 = vld [vmem:[#allocation8 + $0x10] sm:$0xff]  ;;  %s1707_s15 = scalar_lea.vmem %s2154_s17, 256  ;;  %s1809_s19 = smov [#allocation13]  }
  0xc4   : > { %1394 = vmatprep.subr.bf16.mxu0 %v1393_v7  ;;  %1402 = vmatprep.subr.bf16.mxu1 %v1393_v7  ;;  %v1421_v20 = vpack.c.bf16 %v733_v19, %v732_v18  ;;  %v735_v42 = vld [vmem:[#allocation8 + $0x18] sm:$0xff]  ;;  %v730_v49 = vld [vmem:[%s2099_s26] sm:$0xff]  ;;  %v926_v53 = vld [vmem:[#allocation11 + $0x8] sm:$0xff]  ;;  %p1708_p1 = scmp.ne.s32.totalorder %s2154_s17, %s1707_s15  ;;  %s1711_s14 = sshll.u32 %s1809_s19, 4  ;;  %s1712_s14 = int_to_ptr.vmem [resolvable:$false] %s1711_s14 }
  0xc5   : > { %v1425_v48 = vpack.c.bf16 %v735_v42, %v734_v41  ;;  %v731_v51 = vld [vmem:[%s2099_s26 + $0x8] sm:$0xff]  ;;  %v925_v52 = vld [vmem:[#allocation11] sm:$0xff]  ;;  %v927_v55 = vld [vmem:[#allocation11 + $0x10] sm:$0xff]  ;;  %s1713_s8 = scalar_lea.vmem %s1712_s14, 512  ;;  %p1714_p12 = scmp.lt.s32.totalorder %s2154_s17, %s1712_s14 }
  0xc6   : > { %v1429_v54 = vpack.c.bf16 %v926_v53, %v925_v52  ;;  %v928_v56 = vld [vmem:[#allocation11 + $0x18] sm:$0xff]  ;;  %v1271_v58 = vld [vmem:[%s2210_s5] ss:$0 sm:$0xff]  ;;  %p1715_p6 = scmp.lt.s32.totalorder %s1713_s8, %s1707_s15 }
  0xc7   : > { %1396 = vmatpush3.bf16.msra.mxu0 %v1393_v7  ;;  %1404 = vmatpush3.bf16.msra.mxu1 %v1393_v7  ;;  %v1433_v57 = vpack.c.bf16 %v928_v56, %v927_v55  ;;  %p2252_p2 = scmp.ne.s32.totalorder %s2250_s12, 0 }
  0xc8   : > { %1406 = vmatprep.subr.bf16.mxu0 %v1389_v3  ;;  %1414 = vmatprep.subr.bf16.mxu1 %v1413_v15  ;;  %s2160_s26 = scalar_lea.hbm %s2251_s21, %s1286_s27  ;;  %p1716_p13 = por %p1715_p6, %p1714_p12 }
  0xc9   : > { %p1709_p5 = pnand %p1708_p1, %p2252_p2 }
  0xca   : > { %1332 = vmatmul.mubr.msk.f32.vlgmr.msra.gmra.mrb[0].mxu0 %vm456_vm0, %v455_v8  ;;  %1343 = vmatmul.mubr.msk.f32.vlgmr.msra.gmra.mrb[0].mxu1 %vm456_vm0, %v1260_v9 }
  0xcb   : > { %1408 = vmatpush3.bf16.msra.mxu0 %v1389_v3  ;;  %1353 = vmatprep.mubr.msk.f32.mxu0 %vm456_vm0, %v1263_v10  ;;  %v1274_v10 = vld [vmem:[%s2212_s7] ss:$0 sm:$0xff]  ;;  %p1710_p11 = pneg %p1709_p5 }
  0xcc   : > { %1410 = vmatprep.subr.bf16.mxu0 %v1393_v7  ;;  %1416 = vmatpush3.bf16.msra.mxu1 %v1413_v15 }
  0xcd   : > { %1418 = vmatprep.subr.bf16.mxu1 %v1417_v17  ;;  %p1717_p3 = pnand %p1716_p13, %p1710_p11 }
  0xcf   : > { %1412 = vmatpush3.bf16.msra.mxu0 %v1393_v7 }
  0xd0   : > { %1420 = vmatpush3.bf16.msra.mxu1 %v1417_v17  ;;  %1430 = vmatprep.subr.bf16.mxu0 %v1429_v54 }
  0xd1   : > { %1422 = vmatprep.subr.bf16.mxu1 %v1421_v20 }
  0xd2   : > { %1354 = vmatmul.mubr.msk.f32.vlgmr.msra.gmra.mrb[2].mxu0 %vm456_vm0, %v1264_v11 }
  0xd3   : > { %1432 = vmatpush3.bf16.msra.mxu0 %v1429_v54 }
  0xd4   : > { %1434 = vmatprep.subr.bf16.mxu0 %v1433_v57 }
  0xd7   : > { %1436 = vmatpush3.bf16.msra.mxu0 %v1433_v57 }
 0x19d   : > { %v1333_v21 = vpop.f32.mrb[0].mxu0  ;;  %v1344_v22 = vpop.f32.mrb[0].mxu1 }
 0x19e   : > { %v539_v23 = vmul.f32 %v1333_v21, %v1333_v21  ;;  %v625_v24 = vmul.f32 %v1344_v22, %v1344_v22  ;;  %v529_v25 = vpop.f32.mrb[1].mxu0  ;;  %v615_v26 = vpop.f32.mrb[1].mxu1 }
 0x19f   : > { %v538_v27 = vmul.f32 %v529_v25, %v529_v25  ;;  %v624_v28 = vmul.f32 %v615_v26, %v615_v26  ;;  %1043 = vrot.lane.b32.xlu0 %v615_v26, %s1806_s16 }
 0x1a0   : > { %v627_v29 = vadd.f32 %v625_v24, %v539_v23 }
 0x1a1   : > { %v626_v30 = vadd.f32 %v624_v28, %v538_v27 }
 0x1a3   : > { %1045 = vrot.lane.b32.xlu0 %v1344_v22, %s1806_s16 }
 0x1a5   : > { %v1355_v31 = vpop.f32.mrb[2].mxu0 }
 0x1a6   : > { %v713_v32 = vmul.f32 %v1355_v31, %v1355_v31  ;;  %v703_v33 = vpop.f32.mrb[3].mxu0 }
 0x1a7   : > { %v712_v34 = vmul.f32 %v703_v33, %v703_v33  ;;  %1033 = vrot.lane.b32.xlu0 %v529_v25, %s1806_s16  ;;  %1053 = vrot.lane.b32.xlu1 %v703_v33, %s1806_s16 }
 0x1a8   : > { %v715_v35 = vadd.f32 %v713_v32, %v627_v29 }
 0x1a9   : > { %v714_v36 = vadd.f32 %v712_v34, %v626_v30 }
 0x1aa   : > { %1547 = vrsqrt.f32 %v715_v35  ;;  %vm725_vm1 = vcmp.eq.f32.partialorder %v715_v35, inf  ;;  %v728_v46 = vand.u32 2147483648, %v715_v35  ;;  %vm727_vm4 = vcmp.eq.f32.partialorder %v715_v35, 0.0 }
 0x1ab   : > { %1055 = vrot.lane.b32.xlu1 %v1355_v31, %s1806_s16  ;;  %1549 = vrsqrt.f32 %v714_v36  ;;  %vm718_vm2 = vcmp.eq.f32.partialorder %v714_v36, inf  ;;  %v721_v43 = vand.u32 2147483648, %v714_v36  ;;  %vm720_vm3 = vcmp.eq.f32.partialorder %v714_v36, 0.0 }
 0x1af   : > { %1035 = vrot.lane.b32.xlu1 %v1333_v21, %s1806_s16 }
 0x1b4   : > { %v1548_v37 = vpop.eup %1547 }
 0x1b5   : > { %v1550_v38 = vpop.eup %1549  ;;  %v724_v39 = vmul.f32 %v1548_v37, %v715_v35 }
 0x1b6   : > { %v717_v40 = vmul.f32 %v1550_v38, %v714_v36 }
 0x1b7   : > { %v726_v44 = vsel %vm725_vm1, %v715_v35, %v724_v39 }
 0x1b8   : > { %v719_v45 = vsel %vm718_vm2, %v714_v36, %v717_v40  ;;  %v729_v50 = vsel %vm727_vm4, %v728_v46, %v726_v44 }
 0x1b9   : > { %v722_v47 = vsel %vm720_vm3, %v721_v43, %v719_v45 }
 0x1ba   : > { %1364 = vmatprep.mubr.msk.f32.mxu1 %vm456_vm0, %v722_v47 }
 0x1bb   : > { %1365 = vmatmul.mubr.msk.f32.vlgmr.msra.gmra.mrb[2].mxu1 %vm456_vm0, %v729_v50 }
 0x1bc   : > { %1424 = vmatpush3.bf16.msra.mxu1 %v1421_v20  ;;  %1375 = vmatprep.mubr.msk.f32.mxu1 %vm456_vm0, %v730_v49 }
 0x1bd   : > { %1426 = vmatprep.subr.bf16.mxu1 %v1425_v48 }
 0x1c0   : > { %1428 = vmatpush3.bf16.msra.mxu1 %v1425_v48 }
 0x1c3   : > { %1376 = vmatmul.mubr.msk.f32.vlgmr.msra.gmra.mrb[2].mxu1 %vm456_vm0, %v731_v51 }
 0x211   : > { %v1044_v9 = vpop.permute.xlu0 %1043 }
 0x215   : > { %v1046_v15 = vpop.permute.xlu0 %1045 }
 0x219   : > { %v1054_v11 = vpop.permute.xlu1 %1053  ;;  %v1034_v31 = vpop.permute.xlu0 %1033 }
 0x21d   : > { %v1056_v19 = vpop.permute.xlu1 %1055 }
 0x221   : > { %v1036_v29 = vpop.permute.xlu1 %1035 }
 0x296   : > { %v1377_v59 = vpop.f32.mrb[2].mxu1 }
 0x297   : > { %v910_v60 = vadd.f32 %v1377_v59, %v1271_v58  ;;  %v893_v61 = vpop.f32.mrb[3].mxu1 }
 0x298   : > { %v909_v62 = vadd.f32 %v1271_v58, %v893_v61 }
 0x299   : > { %v1273_v63 = vmul.f32 -1.442695, %v910_v60 }
 0x29a   : > { %v1272_v0 = vmul.f32 -1.442695, %v909_v62 }
 0x29b   : > { %1551 = vpow2.f32 %v1273_v63 }
 0x29c   : > { %1553 = vpow2.f32 %v1272_v0 }
 0x2a5   : > { %v1552_v1 = vpop.eup %1551 }
 0x2a6   : > { %v1554_v2 = vpop.eup %1553  ;;  %v918_v3 = vadd.f32 1.0, %v1552_v1 }
 0x2a7   : > { %v917_v4 = vadd.f32 1.0, %v1554_v2 }
 0x2a8   : > { %1555 = vrcp.f32 %v918_v3 }
 0x2a9   : > { %1557 = vrcp.f32 %v917_v4 }
 0x2b2   : > { %v1556_v5 = vpop.eup %1555 }
 0x2b3   : > { %v1558_v6 = vpop.eup %1557  ;;  %v924_v8 = vmul.f32 %v1556_v5, %v910_v60 }
 0x2b4   : > { %v923_v7 = vmul.f32 %v1558_v6, %v909_v62 }
 0x2b6   : > { %1386 = vmatprep.mubr.msk.f32.mxu0 %vm456_vm0, %v923_v7 }
 0x2b7   : > { %1387 = vmatmul.mubr.msk.f32.vlgmr.msra.gmra.mrb[4].mxu0 %vm456_vm0, %v924_v8 }
 0x38a   : > { %v1388_v12 = vpop.f32.mrb[4].mxu0 }
 0x38b   : > { %v1014_v13 = vadd.f32 %v1388_v12, %v1274_v10  ;;  %v1008_v14 = vpop.f32.mrb[5].mxu0 }
 0x38c   : > { %v1009_v16 = vadd.f32 %v1274_v10, %v1008_v14 }
 0x38d   : > { %v1050_v17 = vmul.f32 %v1046_v15, %v1014_v13  ;;  %v1060_v20 = vmul.f32 %v1056_v19, %v1014_v13  ;;  %v1278_v22 = vmul.f32 -1.442695, %v1014_v13  ;;  %v1040_v35 = vmul.f32 %v1036_v29, %v1014_v13 }
 0x38e   : > { %v1049_v18 = vmul.f32 %v1044_v9, %v1009_v16  ;;  %v1059_v21 = vmul.f32 %v1054_v11, %v1009_v16  ;;  %v1277_v23 = vmul.f32 -1.442695, %v1009_v16  ;;  %v1039_v37 = vmul.f32 %v1034_v31, %v1009_v16 }
 0x38f   : > { %1065 = vrot.lane.b32.xlu1 %v1050_v17, %s1807_s3  ;;  %1559 = vpow2.f32 %v1278_v22 }
 0x390   : > { %1063 = vrot.lane.b32.xlu0 %v1049_v18, %s1807_s3  ;;  %1561 = vpow2.f32 %v1277_v23 }
 0x393   : > { %1073 = vrot.lane.b32.xlu1 %v1060_v20, %s1808_s20 }
 0x394   : > { %1071 = vrot.lane.b32.xlu0 %v1059_v21, %s1808_s20 }
 0x399   : > { %v1560_v24 = vpop.eup %1559 }
 0x39a   : > { %v1562_v25 = vpop.eup %1561  ;;  %v1024_v26 = vadd.f32 1.0, %v1560_v24 }
 0x39b   : > { %v1023_v27 = vadd.f32 1.0, %v1562_v25 }
 0x39c   : > { %1563 = vrcp.f32 %v1024_v26 }
 0x39d   : > { %1565 = vrcp.f32 %v1023_v27 }
 0x3a6   : > { %v1564_v28 = vpop.eup %1563 }
 0x3a7   : > { %v1566_v30 = vpop.eup %1565  ;;  %v1030_v32 = vmul.f32 %v1564_v28, %v1014_v13 }
 0x3a8   : > { %v1029_v34 = vmul.f32 %v1566_v30, %v1009_v16 }
 0x3a9   : > { %v1079_v38 = vsel %vm1077_vm5, %v1030_v32, %v1040_v35 }
 0x3aa   : > { %v1078_v40 = vsel %vm1077_vm5, %v1029_v34, %v1039_v37 }
 0x401   : > { %v1066_v33 = vpop.permute.xlu1 %1065 }
 0x402   : > { %v1064_v36 = vpop.permute.xlu0 %1063  ;;  %v1081_v39 = vsel %vm456_vm0, %v1079_v38, %v1066_v33 }
 0x403   : > { %v1080_v42 = vsel %vm456_vm0, %v1078_v40, %v1064_v36 }
 0x405   : > { %v1074_v41 = vpop.permute.xlu1 %1073 }
 0x406   : > { %v1084_v43 = vsel %vm1082_vm6, %v1081_v39, %v1074_v41  ;;  %v1072_v44 = vpop.permute.xlu0 %1071 }
 0x407   : > { %1087 = vst.msk [vmem:[%s446_s22 + $0x8] sm:$0xff] %vm1085_vm7, %v1084_v43  ;;  %v1083_v45 = vsel %vm1082_vm6, %v1080_v42, %v1072_v44 }
 0x408   : > { %1086 = vst.msk [vmem:[%s446_s22] sm:$0xff] %vm1085_vm7, %v1083_v45 }
 0x409   : > { %1720 = shalt.err (!%p1717_p3)
}
 0x40a   : > { %s1721_s16 = scalar_lea.hbm %s2160_s26, 256  ;;  %s1725_s18 = scalar_lea.hbm %s2251_s21, 512 }
 0x40b   : > { %p1722_p0 = scmp.ne.s32.totalorder %s2160_s26, %s1721_s16  ;;  %p1726_p9 = scmp.lt.u32.totalorder %s2160_s26, %s2251_s21 }
 0x40c   : > { %p1727_p10 = scmp.lt.u32.totalorder %s1725_s18, %s1721_s16  ;;  %p1729_p5 = scmp.lt.u32.totalorder %s1721_s16, %s2160_s26 }
 0x40d   : > { %p1723_p7 = pnand %p1722_p0, %p2252_p2 }
 0x40e   : > { %p1728_p1 = por %p1727_p10, %p1726_p9 }
 0x40f   : > { %p1724_p8 = pneg %p1723_p7 }
 0x410   : > { %p1730_p11 = por %p1729_p5, %p1728_p1 }
 0x412   : > { %p1731_p12 = pnand %p1730_p11, %p1724_p8 }
 0x414   : > { %1734 = shalt.err (!%p1731_p12)
}
 0x415   : > { %s1810_s20 = smov 128   ;;  %s1811_s22 = smov 8  }
 0x416   : > { %1468 = dma.vmem_to_hbm [thread:$0]  (%p2252_p2), %s2154_s17, 256, %s2160_s26, %s1089_s9, %s1810_s20, %s1810_s20, %s1811_s22  }
 0x417 PF: > { %s2253_s27 = sld [smem:[#allocation23_spill]]  ;;  %s2254_s13 = sld [smem:[#allocation27_spill]] }
 0x41d   : > { %s1117_s25 = sand.u32 1, %s2253_s27   ;;  %p2255_p6 = scmp.ne.s32.totalorder %s2254_s13, 0 }
 0x41e   : > { %s1118_s15 = scalar_lea.sflag [#allocation4], %s1117_s25 }
 0x41f   : > { %p1484_p13 = pnand %p1242_p4, %p2255_p6 }
 0x421   : > { %1772 = dma.done.wait (!%p1484_p13), %s1118_s15, 256  }
 0x422   : > { %1774 = vsyncadd (!%p1484_p13), %s1118_s15, 4294967040  ;;  %s2256_s30 = sld [smem:[#allocation24_spill]]  ;;  %s2257_s19 = sld [smem:[#allocation25_spill]] }
 0x423   : > { %s2258_s27 = smov %s1781_s28  ;;  %s2259_s28 = smov %s1785_s29 }
 0x428   : > { %p26_p3 = scmp.ge.s32.totalorder %s2256_s30, 4   ;;  %s2260_s29 = smov %s2257_s19 }
 0x42a   :  { %28 = sbr.rel (!%p26_p3) target bundleno = 12 (0xc), region = 133 }
 0x431   :  { %1123 = vsyncpa [#allocation3], 1 }
 0x432   :  { %1125 = vsyncpa [#allocation3 + $0x1], 1 }
 0x433   :  { %1126 = vsyncpa [#allocation6], 1 }
 0x434   :  { %1128 = vsyncpa [#allocation6 + $0x1], 1 }
 0x435   :  { %1129 = vsyncpa [#allocation9], 1 }
 0x436   :  { %1130 = vsyncpa [#allocation12], 1 }
 0x437   :  { %1131 = vsyncpa [#allocation4], 1 }
 0x438   :  { %1133 = vsyncpa [#allocation4 + $0x1], 1 }

</bundles_post_ra>
